<compile_context>
chip_gen: v6e
topology: v6e:2x2x1
jax: 0.10.0
libtpu: 0.0.40
codegen_flags: <defaults>
</compile_context>

<pallas_src>
import functools

import jax
import jax.numpy as jnp
from jax import lax
from jax.experimental import pallas as pl
from jax.experimental.pallas import tpu as pltpu

_BN_EPS = 1e-5
_LN_EPS = 1e-5

# Enough for TILE_L = 4096 (double-buffered x tiles + ~6 MiB of per-tile f32
# intermediates); above v5e's 16 MiB default scoped limit and safely under
# v7x's 64 MiB physical VMEM.  v5e/v6e (128 MiB) could raise this + TILE_L.
_VMEM_LIMIT_BYTES = 32 * 1024 * 1024


# ------------------------- pass 1: global BatchNorm batch statistics -------------------------
def _bn_stats_kernel(xl_ref, xh_ref, wa_l_ref, wa_h_ref, vec_ref, ss_ref, *,
                     c_out, l_total, tile_l, inv_tokens, mask_cols):
    """Accumulate per-channel sum / sum-of-squares of conv1(x) over all tokens.

    On the last grid step the moments + BN affine are folded into per-channel
    (scale, shift): ss_ref[:, 0] = scale, ss_ref[:, 1] = shift.
    """
    t = pl.program_id(0)
    n = pl.program_id(1)

    @pl.when((t == 0) & (n == 0))
    def _init():
        ss_ref[...] = jnp.zeros_like(ss_ref)

    if mask_cols:  # ragged last L tile: keep block padding out of the statistics
        col = t * tile_l + lax.broadcasted_iota(jnp.int32, (1, tile_l), 1)
        valid = col < l_total

    def tile_moments(x_ref, wa_ref):
        x = x_ref[...].astype(jnp.bfloat16)          # bf16 MXU operands, f32 acc
        # rows [:c_out] of wa are the first 1x1-conv weights
        y1 = jnp.dot(wa_ref[:c_out, :], x, preferred_element_type=jnp.float32)
        if mask_cols:
            y1 = jnp.where(valid, y1, 0.0)
        return (jnp.sum(y1, axis=1, keepdims=True),
                jnp.sum(y1 * y1, axis=1, keepdims=True))

    s_l, q_l = tile_moments(xl_ref, wa_l_ref)
    s_h, q_h = tile_moments(xh_ref, wa_h_ref)
    ss_ref[0:c_out, 0:1] += s_l
    ss_ref[0:c_out, 1:2] += q_l
    ss_ref[c_out:, 0:1] += s_h
    ss_ref[c_out:, 1:2] += q_h

    @pl.when((t == pl.num_programs(0) - 1) & (n == pl.num_programs(1) - 1))
    def _finalize():
        mean = ss_ref[:, 0:1] * inv_tokens
        # one-pass variance, clamped so cancellation can never drive it negative
        var = jnp.maximum(ss_ref[:, 1:2] * inv_tokens - mean * mean, 0.0)
        scale = vec_ref[:, 0:1] * lax.rsqrt(var + _BN_EPS)   # bn_gamma folded in
        shift = vec_ref[:, 1:2] - mean * scale               # bn_beta folded in
        ss_ref[:, 0:1] = scale
        ss_ref[:, 1:2] = shift


# ------------------------- pass 2: fused conv/BN/ReLU/conv/LN/score -------------------------
def _local_disc_kernel(xl_ref, xh_ref, wa_l_ref, wa_h_ref, w2_ref, vec_ref,
                       ss_ref, o_ref, *, c_out):
    """One (batch row, L tile) block: both branches fused + channel dot product."""

    def branch(x_ref, wa_ref, row0):
        r = slice(row0, row0 + c_out)
        x = x_ref[...].astype(jnp.bfloat16)
        # fused (conv1 ; linear_shortcut) matmul: rows [:c_out]=conv1, rest=shortcut
        ya = jnp.dot(wa_ref[...], x, preferred_element_type=jnp.float32)   # [2C, T]
        y1 = ya[:c_out, :]
        y_sc = ya[c_out:, :]
        # BatchNorm (global batch stats from pass 1, affine pre-folded) + ReLU
        y = jnp.maximum(y1 * ss_ref[r, 0:1] + ss_ref[r, 1:2], 0.0)
        # second 1x1 conv (bf16 MXU) + bias + residual linear shortcut
        z = jnp.dot(w2_ref[r, :], y.astype(jnp.bfloat16),
                    preferred_element_type=jnp.float32)
        z = z + vec_ref[r, 2:3] + y_sc
        # LayerNorm over channels (sublane axis); ln_gamma folded into rsqrt scale
        mu = jnp.mean(z, axis=0, keepdims=True)                            # [1, T]
        var = jnp.maximum(jnp.mean(z * z, axis=0, keepdims=True) - mu * mu, 0.0)
        a = lax.rsqrt(var + _LN_EPS) * vec_ref[r, 3:4]
        return (z - mu) * a + vec_ref[r, 4:5]

    lo = branch(xl_ref, wa_l_ref, 0)
    hi = branch(xh_ref, wa_h_ref, c_out)
    # lane-dense [1, TILE_L] score tile
    o_ref[...] = jnp.sum(lo * hi, axis=0, keepdims=True)


# ----------------------------------- wrapper -----------------------------------
def _pack_branch_weights(p):
    # [w1 ; ws] stacked on the output-channel axis, bf16 for the MXU
    return jnp.concatenate([p["w1"], p["ws"]], axis=0).astype(jnp.bfloat16)


def local_discriminator(low_features, high_features, low_params, high_params,
                        *, max_tile_l=4096):
    """low_features: [N, C_low, L], high_features: [N, C_high, L] -> [N, L]."""
    N, c_low, L = low_features.shape
    n_h, c_high, l_h = high_features.shape
    assert (N, L) == (n_h, l_h), "low/high features must share batch and length"
    c_out = low_params["w1"].shape[0]
    c2 = 2 * c_out

    if L <= max_tile_l:
        tile_l = L                       # single L tile (block == full dim)
    else:
        assert max_tile_l % 128 == 0     # lane aligned (use multiples of 256 on v6e/v7x)
        tile_l = max_tile_l
    num_t = (L + tile_l - 1) // tile_l
    mask_cols = (L % tile_l) != 0        # ragged tail tile -> mask BN statistics
    grid = (num_t, N)

    wa_l = _pack_branch_weights(low_params)                      # [2C, c_low]  bf16
    wa_h = _pack_branch_weights(high_params)                     # [2C, c_high] bf16
    w2 = jnp.concatenate([low_params["w2"], high_params["w2"]],
                         axis=0).astype(jnp.bfloat16)            # [2C, c_out]  bf16
    vec = jnp.stack(
        [jnp.concatenate([low_params[k], high_params[k]])
         for k in ("bn_g", "bn_b", "b2", "ln_g", "ln_b")], axis=1)  # [2C, 5] f32

    # activations are read straight from their native [N, C, L] layout
    x_low_spec = pl.BlockSpec((None, c_low, tile_l), lambda t, n: (n, 0, t))
    x_high_spec = pl.BlockSpec((None, c_high, tile_l), lambda t, n: (n, 0, t))
    # weights / params: constant index_map -> DMA'd once, VMEM resident across tiles
    const = lambda shape: pl.BlockSpec(shape, lambda t, n: (0, 0))

    # ---- pass 1: global BN batch statistics -> folded per-channel (scale, shift)
    stats_fn = functools.partial(
        _bn_stats_kernel, c_out=c_out, l_total=L, tile_l=tile_l,
        inv_tokens=1.0 / float(N * L), mask_cols=mask_cols)
    bn_ss = pl.pallas_call(
        stats_fn,
        out_shape=jax.ShapeDtypeStruct((c2, 2), jnp.float32),
        grid_spec=pltpu.PrefetchScalarGridSpec(
            num_scalar_prefetch=0,
            grid=grid,
            in_specs=[x_low_spec, x_high_spec,
                      const(wa_l.shape), const(wa_h.shape), const(vec.shape)],
            out_specs=pl.BlockSpec((c2, 2), lambda t, n: (0, 0)),
        ),
        compiler_params=pltpu.CompilerParams(
            # reduction into one shared accumulator -> sequential
            dimension_semantics=("arbitrary", "arbitrary"),
            vmem_limit_bytes=_VMEM_LIMIT_BYTES,
        ),
    )(low_features, high_features, wa_l, wa_h, vec)

    # ---- pass 2: streamed fused forward over (L tiles, batch) -> lane-dense scores
    main_fn = functools.partial(_local_disc_kernel, c_out=c_out)
    scores = pl.pallas_call(
        main_fn,
        out_shape=jax.ShapeDtypeStruct((N, 1, L), jnp.float32),
        grid_spec=pltpu.PrefetchScalarGridSpec(
            num_scalar_prefetch=0,
            grid=grid,
            in_specs=[x_low_spec, x_high_spec,
                      const(wa_l.shape), const(wa_h.shape), const(w2.shape),
                      const(vec.shape), const((c2, 2))],
            out_specs=pl.BlockSpec((None, 1, tile_l), lambda t, n: (n, 0, t)),
        ),
        compiler_params=pltpu.CompilerParams(
            # every (L tile, batch row) block is independent -> megacore shardable
            dimension_semantics=("parallel", "parallel"),
            vmem_limit_bytes=_VMEM_LIMIT_BYTES,
        ),
    )(low_features, high_features, wa_l, wa_h, w2, vec, bn_ss)

    return scores[:, 0, :]


# ---------------------------- params & pure-JAX references ----------------------------
def init_mi_params(key, c_in, c_out):
    """Deterministic params matching the module's shapes (PyTorch [out, in] layout)."""
    k1, k2, k3, k4 = jax.random.split(key, 4)
    w1 = jax.random.uniform(k1, (c_out, c_in), jnp.float32, -0.1, 0.1)
    w2 = jax.random.uniform(k2, (c_out, c_out), jnp.float32, -0.1, 0.1)
    b2 = jax.random.uniform(k3, (c_out,), jnp.float32, -0.1, 0.1)
    ws = jax.random.uniform(k4, (c_out, c_in), jnp.float32, -0.01, 0.01)
    if c_out >= c_in:
        idx = jnp.arange(c_in)
        ws = ws.at[idx, idx].set(1.0)      # masked_fill of the identity block
    return dict(
        w1=w1, w2=w2, b2=b2, ws=ws,
        bn_g=jnp.ones((c_out,), jnp.float32), bn_b=jnp.zeros((c_out,), jnp.float32),
        ln_g=jnp.ones((c_out,), jnp.float32), ln_b=jnp.zeros((c_out,), jnp.float32),
    )


def _mi_ref(x, p, mxu_dtype=None):
    """MI1x1ConvNet reference in NCL layout (train-mode BN).

    mxu_dtype=jnp.bfloat16 emulates the kernel's bf16 MXU operands (f32 accumulation);
    mxu_dtype=None is the exact f32 reference.
    """
    if mxu_dtype is None:
        cast, prec = (lambda a: a), lax.Precision.HIGHEST
    else:
        cast, prec = (lambda a: a.astype(mxu_dtype)), lax.Precision.DEFAULT
    mm = lambda w, v: jnp.einsum("oi,nil->nol", cast(w), cast(v),
                                 preferred_element_type=jnp.float32, precision=prec)
    y = mm(p["w1"], x)
    mean = jnp.mean(y, axis=(0, 2), keepdims=True)
    var = jnp.mean((y - mean) ** 2, axis=(0, 2), keepdims=True)
    y = (y - mean) / jnp.sqrt(var + _BN_EPS) * p["bn_g"][None, :, None] + p["bn_b"][None, :, None]
    y = jnp.maximum(y, 0.0)
    h = mm(p["w2"], y) + p["b2"][None, :, None] + mm(p["ws"], x)
    mu = jnp.mean(h, axis=1, keepdims=True)
    v = jnp.mean((h - mu) ** 2, axis=1, keepdims=True)
    return (h - mu) / jnp.sqrt(v + _LN_EPS) * p["ln_g"][None, :, None] + p["ln_b"][None, :, None]


def _local_disc_ref(low, high, lp, hp, mxu_dtype=None):
    return jnp.sum(_mi_ref(low, lp, mxu_dtype) * _mi_ref(high, hp, mxu_dtype), axis=1)


# ----------------------------------------- test -----------------------------------------
def _run_case(key, *, batch, c_low, c_high, c_out, length, max_tile_l):
    k1, k2, k3, k4 = jax.random.split(key, 4)
    low = jax.random.normal(k1, (batch, c_low, length), jnp.float32)
    high = jax.random.normal(k2, (batch, c_high, length), jnp.float32)
    lp = init_mi_params(k3, c_low, c_out)
    hp = init_mi_params(k4, c_high, c_out)

    scores = local_discriminator(low, high, lp, hp, max_tile_l=max_tile_l)
    scores = jax.block_until_ready(scores)
    assert scores.shape == (batch, length), scores.shape
    assert scores.dtype == jnp.float32
    assert bool(jnp.all(jnp.isfinite(scores)))

    # Structure / fusion / BN / LN check against a reference that uses the same
    # bf16 MXU operand rounding (f32 accumulation): should match tightly.
    ref_mxu = _local_disc_ref(low, high, lp, hp, mxu_dtype=jnp.bfloat16)
    assert bool(jnp.allclose(scores, ref_mxu, rtol=2e-3, atol=1e-2)), (
        float(jnp.max(jnp.abs(scores - ref_mxu))))

    # Numerics sanity check against the exact f32 reference: the only systematic
    # difference is the (review-requested) bf16 MXU operand rounding.
    ref_f32 = _local_disc_ref(low, high, lp, hp, mxu_dtype=None)
    rel_l2 = float(jnp.linalg.norm(scores - ref_f32)
                   / (jnp.linalg.norm(ref_f32) + 1e-12))
    assert rel_l2 < 3e-2, rel_l2


if __name__ == "__main__":
    key = jax.random.PRNGKey(0)
    k_a, k_b = jax.random.split(key)
    # Small demo shape: single L tile per batch row.
    _run_case(k_a, batch=2, c_low=4, c_high=8, c_out=32, length=16, max_tile_l=4096)
    # Multi-tile + ragged tail path: tile_l=128 -> 3 L tiles (last one partial),
    # exercising masked global-BN-stat accumulation and boundary blocks.
    _run_case(k_b, batch=2, c_low=4, c_high=8, c_out=32, length=300, max_tile_l=128)
    print("KERNEL_OK")
</pallas_src>

<mosaic_0001>
module attributes {stable_mosaic.version = 11 : i64} {
  func.func @_bn_stats_kernel(%arg0: i32, %arg1: i32, %arg2: memref<1x4x16xf32, #tpu.memory_space<vmem>>, %arg3: memref<1x8x16xf32, #tpu.memory_space<vmem>>, %arg4: memref<64x4xbf16, #tpu.memory_space<vmem>>, %arg5: memref<64x8xbf16, #tpu.memory_space<vmem>>, %arg6: memref<64x5xf32, #tpu.memory_space<vmem>>, %arg7: memref<64x2xf32, #tpu.memory_space<vmem>>) attributes {dimension_semantics = [#tpu.dimension_semantics<arbitrary>, #tpu.dimension_semantics<arbitrary>], iteration_bounds = array<i64: 1, 2>, scalar_prefetch = 0 : i64, scratch_operands = 0 : i64, tpu.core_type = #tpu.core_type<tc>, window_params = [{transform_indices = @transform_0, window_bounds = array<i64: 1, 4, 16>}, {transform_indices = @transform_1, window_bounds = array<i64: 1, 8, 16>}, {pipeline_mode = #tpu.pipeline_mode<synchronous>, transform_indices = @transform_2, window_bounds = array<i64: 64, 4>}, {pipeline_mode = #tpu.pipeline_mode<synchronous>, transform_indices = @transform_3, window_bounds = array<i64: 64, 8>}, {pipeline_mode = #tpu.pipeline_mode<synchronous>, transform_indices = @transform_4, window_bounds = array<i64: 64, 5>}, {pipeline_mode = #tpu.pipeline_mode<synchronous>, transform_indices = @transform_5, window_bounds = array<i64: 64, 2>}]} {
    %c0_i32 = arith.constant 0 : i32
    %0 = arith.cmpi eq, %arg0, %c0_i32 : i32
    %c0_i32_0 = arith.constant 0 : i32
    %1 = arith.cmpi eq, %arg1, %c0_i32_0 : i32
    %2 = arith.andi %0, %1 : i1
    %3 = arith.extui %2 : i1 to i32
    %c0_i32_1 = arith.constant 0 : i32
    %4 = arith.cmpi ne, %3, %c0_i32_1 : i32
    scf.if %4 {
      %cst_32 = arith.constant 0.000000e+00 : f32
      %42 = vector.broadcast %cst_32 : f32 to vector<64x2xf32>
      %c0_33 = arith.constant 0 : index
      %c0_34 = arith.constant 0 : index
      %43 = vector.load %arg7[%c0_33, %c0_34] : memref<64x2xf32, #tpu.memory_space<vmem>>, vector<64x2xf32>
      tpu.vector_store %arg7[%c0_33, %c0_34], %42 {strides = array<i32>} : memref<64x2xf32, #tpu.memory_space<vmem>>, vector<64x2xf32>,
    } else {
    }
    %c0 = arith.constant 0 : index
    %c0_2 = arith.constant 0 : index
    %c0_3 = arith.constant 0 : index
    %5 = vector.load %arg2[%c0, %c0_2, %c0_3] : memref<1x4x16xf32, #tpu.memory_space<vmem>>, vector<1x4x16xf32>
    %6 = vector.shape_cast %5 : vector<1x4x16xf32> to vector<4x16xf32>
    %7 = arith.truncf %6 : vector<4x16xf32> to vector<4x16xbf16>
    %c0_4 = arith.constant 0 : index
    %c0_5 = arith.constant 0 : index
    %8 = vector.load %arg4[%c0_4, %c0_5] : memref<64x4xbf16, #tpu.memory_space<vmem>>, vector<32x4xbf16>
    %cst = arith.constant dense<0.000000e+00> : vector<32x16xf32>
    %9 = tpu.matmul %8, %7, %cst {dimension_numbers = #tpu.dot_dimension_numbers<[1], [0], [0], [1], [0, 0, 1, 1], [], []>} : vector<32x4xbf16>, vector<4x16xbf16>, vector<32x16xf32> -> vector<32x16xf32>
    %cst_6 = arith.constant dense<0.000000e+00> : vector<32xf32>
    %10 = vector.multi_reduction <add>, %9, %cst_6 [1] : vector<32x16xf32> to vector<32xf32>
    %11 = vector.shape_cast %10 : vector<32xf32> to vector<32x1xf32>
    %12 = arith.mulf %9, %9 : vector<32x16xf32>
    %cst_7 = arith.constant dense<0.000000e+00> : vector<32xf32>
    %13 = vector.multi_reduction <add>, %12, %cst_7 [1] : vector<32x16xf32> to vector<32xf32>
    %14 = vector.shape_cast %13 : vector<32xf32> to vector<32x1xf32>
    %c0_8 = arith.constant 0 : index
    %c0_9 = arith.constant 0 : index
    %c0_10 = arith.constant 0 : index
    %15 = vector.load %arg3[%c0_8, %c0_9, %c0_10] : memref<1x8x16xf32, #tpu.memory_space<vmem>>, vector<1x8x16xf32>
    %16 = vector.shape_cast %15 : vector<1x8x16xf32> to vector<8x16xf32>
    %17 = arith.truncf %16 : vector<8x16xf32> to vector<8x16xbf16>
    %c0_11 = arith.constant 0 : index
    %c0_12 = arith.constant 0 : index
    %18 = vector.load %arg5[%c0_11, %c0_12] : memref<64x8xbf16, #tpu.memory_space<vmem>>, vector<32x8xbf16>
    %cst_13 = arith.constant dense<0.000000e+00> : vector<32x16xf32>
    %19 = tpu.matmul %18, %17, %cst_13 {dimension_numbers = #tpu.dot_dimension_numbers<[1], [0], [0], [1], [0, 0, 1, 1], [], []>} : vector<32x8xbf16>, vector<8x16xbf16>, vector<32x16xf32> -> vector<32x16xf32>
    %cst_14 = arith.constant dense<0.000000e+00> : vector<32xf32>
    %20 = vector.multi_reduction <add>, %19, %cst_14 [1] : vector<32x16xf32> to vector<32xf32>
    %21 = vector.shape_cast %20 : vector<32xf32> to vector<32x1xf32>
    %22 = arith.mulf %19, %19 : vector<32x16xf32>
    %cst_15 = arith.constant dense<0.000000e+00> : vector<32xf32>
    %23 = vector.multi_reduction <add>, %22, %cst_15 [1] : vector<32x16xf32> to vector<32xf32>
    %24 = vector.shape_cast %23 : vector<32xf32> to vector<32x1xf32>
    %c0_16 = arith.constant 0 : index
    %c0_17 = arith.constant 0 : index
    %25 = vector.load %arg7[%c0_16, %c0_17] : memref<64x2xf32, #tpu.memory_space<vmem>>, vector<32x1xf32>
    %26 = arith.addf %25, %11 : vector<32x1xf32>
    %c0_18 = arith.constant 0 : index
    %c0_19 = arith.constant 0 : index
    %27 = vector.load %arg7[%c0_18, %c0_19] : memref<64x2xf32, #tpu.memory_space<vmem>>, vector<32x1xf32>
    tpu.vector_store %arg7[%c0_18, %c0_19], %26 {strides = array<i32>} : memref<64x2xf32, #tpu.memory_space<vmem>>, vector<32x1xf32>,
    %c0_20 = arith.constant 0 : index
    %c1 = arith.constant 1 : index
    %28 = vector.load %arg7[%c0_20, %c1] : memref<64x2xf32, #tpu.memory_space<vmem>>, vector<32x1xf32>
    %29 = arith.addf %28, %14 : vector<32x1xf32>
    %c0_21 = arith.constant 0 : index
    %c1_22 = arith.constant 1 : index
    %30 = vector.load %arg7[%c0_21, %c1_22] : memref<64x2xf32, #tpu.memory_space<vmem>>, vector<32x1xf32>
    tpu.vector_store %arg7[%c0_21, %c1_22], %29 {strides = array<i32>} : memref<64x2xf32, #tpu.memory_space<vmem>>, vector<32x1xf32>,
    %c32 = arith.constant 32 : index
    %c0_23 = arith.constant 0 : index
    %31 = vector.load %arg7[%c32, %c0_23] : memref<64x2xf32, #tpu.memory_space<vmem>>, vector<32x1xf32>
    %32 = arith.addf %31, %21 : vector<32x1xf32>
    %c32_24 = arith.constant 32 : index
    %c0_25 = arith.constant 0 : index
    %33 = vector.load %arg7[%c32_24, %c0_25] : memref<64x2xf32, #tpu.memory_space<vmem>>, vector<32x1xf32>
    tpu.vector_store %arg7[%c32_24, %c0_25], %32 {strides = array<i32>} : memref<64x2xf32, #tpu.memory_space<vmem>>, vector<32x1xf32>,
    %c32_26 = arith.constant 32 : index
    %c1_27 = arith.constant 1 : index
    %34 = vector.load %arg7[%c32_26, %c1_27] : memref<64x2xf32, #tpu.memory_space<vmem>>, vector<32x1xf32>
    %35 = arith.addf %34, %24 : vector<32x1xf32>
    %c32_28 = arith.constant 32 : index
    %c1_29 = arith.constant 1 : index
    %36 = vector.load %arg7[%c32_28, %c1_29] : memref<64x2xf32, #tpu.memory_space<vmem>>, vector<32x1xf32>
    tpu.vector_store %arg7[%c32_28, %c1_29], %35 {strides = array<i32>} : memref<64x2xf32, #tpu.memory_space<vmem>>, vector<32x1xf32>,
    %c0_i32_30 = arith.constant 0 : i32
    %37 = arith.cmpi eq, %arg0, %c0_i32_30 : i32
    %c1_i32 = arith.constant 1 : i32
    %38 = arith.cmpi eq, %arg1, %c1_i32 : i32
    %39 = arith.andi %37, %38 : i1
    %40 = arith.extui %39 : i1 to i32
    %c0_i32_31 = arith.constant 0 : i32
    %41 = arith.cmpi ne, %40, %c0_i32_31 : i32
    scf.if %41 {
      %c0_32 = arith.constant 0 : index
      %c0_33 = arith.constant 0 : index
      %42 = vector.load %arg7[%c0_32, %c0_33] : memref<64x2xf32, #tpu.memory_space<vmem>>, vector<64x1xf32>
      %cst_34 = arith.constant 3.125000e-02 : f32
      %43 = vector.broadcast %cst_34 : f32 to vector<64x1xf32>
      %44 = arith.mulf %42, %43 : vector<64x1xf32>
      %c0_35 = arith.constant 0 : index
      %c1_36 = arith.constant 1 : index
      %45 = vector.load %arg7[%c0_35, %c1_36] : memref<64x2xf32, #tpu.memory_space<vmem>>, vector<64x1xf32>
      %cst_37 = arith.constant 3.125000e-02 : f32
      %46 = vector.broadcast %cst_37 : f32 to vector<64x1xf32>
      %47 = arith.mulf %45, %46 : vector<64x1xf32>
      %48 = arith.mulf %44, %44 : vector<64x1xf32>
      %49 = arith.subf %47, %48 : vector<64x1xf32>
      %cst_38 = arith.constant 0.000000e+00 : f32
      %50 = vector.broadcast %cst_38 : f32 to vector<64x1xf32>
      %51 = arith.maximumf %49, %50 : vector<64x1xf32>
      %c0_39 = arith.constant 0 : index
      %c0_40 = arith.constant 0 : index
      %52 = vector.load %arg6[%c0_39, %c0_40] : memref<64x5xf32, #tpu.memory_space<vmem>>, vector<64x1xf32>
      %cst_41 = arith.constant 9.99999974E-6 : f32
      %53 = vector.broadcast %cst_41 : f32 to vector<64x1xf32>
      %54 = arith.addf %51, %53 : vector<64x1xf32>
      %55 = math.rsqrt %54 : vector<64x1xf32>
      %56 = arith.mulf %52, %55 : vector<64x1xf32>
      %c0_42 = arith.constant 0 : index
      %c1_43 = arith.constant 1 : index
      %57 = vector.load %arg6[%c0_42, %c1_43] : memref<64x5xf32, #tpu.memory_space<vmem>>, vector<64x1xf32>
      %58 = arith.mulf %44, %56 : vector<64x1xf32>
      %59 = arith.subf %57, %58 : vector<64x1xf32>
      %c0_44 = arith.constant 0 : index
      %c0_45 = arith.constant 0 : index
      %60 = vector.load %arg7[%c0_44, %c0_45] : memref<64x2xf32, #tpu.memory_space<vmem>>, vector<64x1xf32>
      tpu.vector_store %arg7[%c0_44, %c0_45], %56 {strides = array<i32>} : memref<64x2xf32, #tpu.memory_space<vmem>>, vector<64x1xf32>,
      %c0_46 = arith.constant 0 : index
      %c1_47 = arith.constant 1 : index
      %61 = vector.load %arg7[%c0_46, %c1_47] : memref<64x2xf32, #tpu.memory_space<vmem>>, vector<64x1xf32>
      tpu.vector_store %arg7[%c0_46, %c1_47], %59 {strides = array<i32>} : memref<64x2xf32, #tpu.memory_space<vmem>>, vector<64x1xf32>,
    } else {
    }
    return
  }
  func.func @transform_0(%arg0: i32, %arg1: i32) -> (i32, i32, i32) {
    %c0_i32 = arith.constant 0 : i32
    %c0_i32_0 = arith.constant 0 : i32
    return %arg1, %c0_i32, %arg0 : i32, i32, i32
  }
  func.func @transform_1(%arg0: i32, %arg1: i32) -> (i32, i32, i32) {
    %c0_i32 = arith.constant 0 : i32
    %c0_i32_0 = arith.constant 0 : i32
    return %arg1, %c0_i32, %arg0 : i32, i32, i32
  }
  func.func @transform_2(%arg0: i32, %arg1: i32) -> (i32, i32) {
    %c0_i32 = arith.constant 0 : i32
    %c0_i32_0 = arith.constant 0 : i32
    %c0_i32_1 = arith.constant 0 : i32
    return %c0_i32, %c0_i32_0 : i32, i32
  }
  func.func @transform_3(%arg0: i32, %arg1: i32) -> (i32, i32) {
    %c0_i32 = arith.constant 0 : i32
    %c0_i32_0 = arith.constant 0 : i32
    %c0_i32_1 = arith.constant 0 : i32
    return %c0_i32, %c0_i32_0 : i32, i32
  }
  func.func @transform_4(%arg0: i32, %arg1: i32) -> (i32, i32) {
    %c0_i32 = arith.constant 0 : i32
    %c0_i32_0 = arith.constant 0 : i32
    %c0_i32_1 = arith.constant 0 : i32
    return %c0_i32, %c0_i32_0 : i32, i32
  }
  func.func @transform_5(%arg0: i32, %arg1: i32) -> (i32, i32) {
    %c0_i32 = arith.constant 0 : i32
    %c0_i32_0 = arith.constant 0 : i32
    %c0_i32_1 = arith.constant 0 : i32
    return %c0_i32, %c0_i32_0 : i32, i32
  }
}

</mosaic_0001>

<bundles_post_ra>
// kernel: tpu_custom_call.1
= control target key start
LH: loop header
LB: loop body
LE: loop exit
PB: predicated region body
PF: predicated region fallthrough
CT: control target
= control target key end

     0   :  { %s936_s18 = smov 0   ;;  %s938_s19 = smov 0   ;;  %s1317_s0 = inlined_call_operand.vmem [shape: f32[2,4,16], index: 0, kind: input, shape index: {}]   ;;  %s1318_s1 = inlined_call_operand.vmem [shape: f32[2,8,16], index: 1, kind: input, shape index: {}]   ;;  %s1319_s2 = inlined_call_operand.vmem [shape: bf16[64,4], index: 2, kind: input, shape index: {}]   ;;  %s1320_s3 = inlined_call_operand.vmem [shape: bf16[64,8], index: 3, kind: input, shape index: {}]   ;;  %s1321_s4 = inlined_call_operand.vmem [shape: f32[64,5], index: 4, kind: input, shape index: {}]   ;;  %s1322_s5 = inlined_call_operand.vmem [shape: f32[64,2], index: 5, kind: output, shape index: {}]  }
   0x1   :  { %s940_s20 = smov 0  }
   0x2 LB: > { %s24_s21 = sadd.s32 1, %s897_s19  ;;  %p795_p0 = scmp.ge.s32.totalorder %s901_s20, 1  ;;  %s901_s20 = sphi %s940_s20, %s15_s20   ;;  %s897_s19 = sphi %s938_s19, %s1324_s19   ;;  %s893_s18 = sphi %s936_s18, %s1323_s18  }
   0x3   : > { %p25_p1 = scmp.ge.s32.totalorder %s24_s21, 2  ;;  %p212_p2 = scmp.lt.s32.totalorder %s901_s20, 3 }
   0x5   : > { %s1326_s21 = smov (%p25_p1, %s24_s21), 0  ;;  %p213_p3 = pnand %p795_p0, %p212_p2 }
   0x6   : > { %p244_p4 = scmp.lt.s32.totalorder (!%p213_p3), %s893_s18, 1  ;;  %p260_p5 = scmp.eq.s32.totalorder (!%p213_p3), %s893_s18, 0 }
   0x7   : > { %216 = sbr.rel (%p213_p3) target bundleno = 782 (0x30e), region = 40 }
   0xc   : > { %s245_s22 = scalar_select %p244_p4, %s893_s18, 1  ;;  %vm265_vm0 = vcmask (%p260_p5), 15360   ;;  %v903_v0 = vmov (%p260_p5), 0.0  }
   0xd   : > { %264 = sbr.rel (!%p260_p5) target bundleno = 18 (0x12), region = 44  ;;  %266 = vst.msk [vmem:[%s1322_s5] sm:$0xff] (%p260_p5), %vm265_vm0, %v903_v0  ;;  %267 = vst.msk [vmem:[%s1322_s5 + $0x8] sm:$0xff] (%p260_p5), %vm265_vm0, %v903_v0 }
   0xe   : > { %s796_s23 = sshll.u32 %s245_s22, 2  ;;  %s797_s24 = sshll.u32 %s245_s22, 3  ;;  %268 = vst.msk [vmem:[%s1322_s5 + $0x10] sm:$0xff] (%p260_p5), %vm265_vm0, %v903_v0  ;;  %269 = vst.msk [vmem:[%s1322_s5 + $0x18] sm:$0xff] (%p260_p5), %vm265_vm0, %v903_v0 }
   0xf   : > { %s250_s27 = scalar_lea.vmem %s1317_s0, %s796_s23  ;;  %s257_s30 = scalar_lea.vmem %s1318_s1, %s797_s24  ;;  %270 = vst.msk [vmem:[%s1322_s5 + $0x20] sm:$0xff] (%p260_p5), %vm265_vm0, %v903_v0  ;;  %271 = vst.msk [vmem:[%s1322_s5 + $0x28] sm:$0xff] (%p260_p5), %vm265_vm0, %v903_v0 }
  0x10   : > { %272 = vst.msk [vmem:[%s1322_s5 + $0x30] sm:$0xff] (%p260_p5), %vm265_vm0, %v903_v0  ;;  %273 = vst.msk [vmem:[%s1322_s5 + $0x38] sm:$0xff] (%p260_p5), %vm265_vm0, %v903_v0 }
  0x12 PF: > { %v274_v1 = vld [vmem:[%s250_s27] sm:$0xf]  ;;  %vm297_vm1 = vcmask 1041408   ;;  %vm402_vm2 = vcmask 1043456   ;;  %vm290_vm3 = vcmask 31744   ;;  %vm395_vm4 = vcmask 64512  }
  0x13   : > { %v379_v2 = vld [vmem:[%s257_s30] sm:$0xff]  ;;  %v275_v4 = vpack.c.bf16 %v274_v1, %v274_v1  ;;  %v861_v7 = vld [vmem:[%s1319_s2 + $0x8] sm:$0xff]   ;;  %vm350_vm5 = vcmask 130048   ;;  %p533_p6 = scmp.eq.s32.totalorder %s893_s18, 1  ;;  %vm491_vm6 = vcmask 7168   ;;  %vm504_vm7 = vcmask 15368  }
  0x14   : > { %v859_v3 = vld [vmem:[%s1319_s2] sm:$0xff]   ;;  %v380_v5 = vpack.c.bf16 %v379_v2, %v379_v2  ;;  %v862_v10 = vld [vmem:[%s1320_s3 + $0x8] sm:$0xff]   ;;  %s904_s25 = smov (%p533_p6), 1   ;;  %s905_s7 = smov (%p533_p6), 127  }
  0x15   : > { %v860_v6 = vld [vmem:[%s1320_s3] sm:$0xff]   ;;  %820 = vmatprep.mubr.msk.bf16.mxu0 %vm290_vm3, %v859_v3  ;;  %830 = vmatprep.subr.msk.bf16.mxu0 %vm297_vm1, %v275_v4  ;;  %v299_v8 = vsel %vm297_vm1, %v275_v4, 0  ;;  %v485_v44 = vld [vmem:[%s1322_s5 + $0x10] sm:$0xff]  ;;  %v486_v50 = vld [vmem:[%s1322_s5 + $0x18] sm:$0xff] }
  0x16   : > { %831 = vmatprep.subr.msk.bf16.mxu1 %vm402_vm2, %v380_v5  ;;  %v404_v9 = vsel %vm402_vm2, %v380_v5, 0  ;;  %819 = vmatpush3.bf16.msra.mxu0 %v299_v8  ;;  %v483_v49 = vld [vmem:[%s1322_s5] sm:$0xff]  ;;  %v510_v61 = vld [vmem:[%s1322_s5 + $0x28] sm:$0xff] }
  0x17   : > { %825 = vmatpush3.bf16.msra.mxu1 %v404_v9  ;;  %826 = vmatprep.mubr.msk.bf16.mxu1 %vm395_vm4, %v860_v6  ;;  %v511_v43 = vld [vmem:[%s1322_s5 + $0x30] sm:$0xff]  ;;  %v509_v55 = vld [vmem:[%s1322_s5 + $0x20] sm:$0xff]  ;;  %v512_v56 = vld [vmem:[%s1322_s5 + $0x38] sm:$0xff] }
  0x18   : > { %v484_v2 = vld [vmem:[%s1322_s5 + $0x8] sm:$0xff] }
  0x19   : > { %821 = vmatmul.mubr.msk.bf16.vlgmr.msra.gmra.mxu0 %vm290_vm3, %v861_v7 }
  0x1a   : > { %827 = vmatmul.mubr.msk.bf16.vlgmr.msra.gmra.mxu1 %vm395_vm4, %v862_v10 }
  0xd9   : > { %v822_v11 = vpop.f32.mrf.mxu0 }
  0xda   : > { %v828_v12 = vpop.f32.mrf.mxu1  ;;  %v357_v14 = vsel %vm350_vm5, %v822_v11, 0.0  ;;  %v365_v29 = vmul.f32 %v822_v11, %v822_v11 }
  0xdb   : > { %v461_v13 = vsel %vm350_vm5, %v828_v12, 0.0  ;;  %358 = vadd.xlane.f32.xlu1 %v357_v14  ;;  %v335_v16 = vpop.f32.mrf.mxu0  ;;  %v469_v37 = vmul.f32 %v828_v12, %v828_v12 }
  0xdc   : > { %v440_v15 = vpop.f32.mrf.mxu1  ;;  %462 = vadd.xlane.f32.xlu0 %v461_v13  ;;  %v351_v18 = vsel %vm350_vm5, %v335_v16, 0.0  ;;  %v363_v21 = vmul.f32 %v335_v16, %v335_v16  ;;  %v373_v36 = vsel %vm350_vm5, %v365_v29, 0.0 }
  0xdd   : > { %v823_v17 = vpop.f32.mrf.mxu0  ;;  %v455_v22 = vsel %vm350_vm5, %v440_v15, 0.0  ;;  %v467_v33 = vmul.f32 %v440_v15, %v440_v15  ;;  %v477_v42 = vsel %vm350_vm5, %v469_v37, 0.0 }
  0xde   : > { %v360_v19 = vsel %vm350_vm5, %v823_v17, 0.0  ;;  %v829_v20 = vpop.f32.mrf.mxu1  ;;  %v366_v25 = vmul.f32 %v823_v17, %v823_v17  ;;  %v367_v26 = vsel %vm350_vm5, %v363_v21, 0.0 }
  0xdf   : > { %361 = vadd.xlane.f32.xlu1 %v360_v19  ;;  %v464_v23 = vsel %vm350_vm5, %v829_v20, 0.0  ;;  %v338_v28 = vpop.f32.mrf.mxu0  ;;  %v470_v38 = vmul.f32 %v829_v20, %v829_v20  ;;  %v471_v40 = vsel %vm350_vm5, %v467_v33, 0.0 }
  0xe0   : > { %352 = vadd.xlane.f32.xlu0 %v351_v18  ;;  %v443_v24 = vpop.f32.mrf.mxu1  ;;  %v364_v30 = vmul.f32 %v338_v28, %v338_v28  ;;  %v376_v31 = vsel %vm350_vm5, %v366_v25, 0.0  ;;  %v354_v32 = vsel %vm350_vm5, %v338_v28, 0.0 }
  0xe1   : > { %v458_v27 = vsel %vm350_vm5, %v443_v24, 0.0  ;;  %v468_v34 = vmul.f32 %v443_v24, %v443_v24  ;;  %v480_v41 = vsel %vm350_vm5, %v470_v38, 0.0 }
  0xe2   : > { %v370_v35 = vsel %vm350_vm5, %v364_v30, 0.0 }
  0xe3   : > { %465 = vadd.xlane.f32.xlu1 %v464_v23  ;;  %v474_v39 = vsel %vm350_vm5, %v468_v34, 0.0 }
  0xe4   : > { %456 = vadd.xlane.f32.xlu0 %v455_v22 }
  0xe7   : > { %459 = vadd.xlane.f32.xlu1 %v458_v27 }
  0xe8   : > { %368 = vadd.xlane.f32.xlu0 %v367_v26 }
  0xeb   : > { %377 = vadd.xlane.f32.xlu1 %v376_v31 }
  0xec   : > { %355 = vadd.xlane.f32.xlu0 %v354_v32 }
  0xef   : > { %371 = vadd.xlane.f32.xlu1 %v370_v35 }
  0xf0   : > { %374 = vadd.xlane.f32.xlu0 %v373_v36 }
  0xf3   : > { %475 = vadd.xlane.f32.xlu1 %v474_v39 }
  0xf4   : > { %472 = vadd.xlane.f32.xlu0 %v471_v40 }
  0xf7   : > { %481 = vadd.xlane.f32.xlu1 %v480_v41 }
  0xf8   : > { %478 = vadd.xlane.f32.xlu0 %v477_v42 }
 0x164   : > { %v359_v46 = vpop.xlane.xlu1 %358 }
 0x165   : > { %v463_v45 = vpop.xlane.xlu0 %462  ;;  %v489_v48 = vadd.f32 %v485_v44, %v359_v46 }
 0x166   : > { %v515_v47 = vadd.f32 %v511_v43, %v463_v45 }
 0x167   : > { %494 = vst.msk [vmem:[%s1322_s5 + $0x10] sm:$0xff] %vm491_vm6, %v489_v48 }
 0x168   : > { %519 = vst.msk [vmem:[%s1322_s5 + $0x30] sm:$0xff] %vm491_vm6, %v515_v47  ;;  %v362_v52 = vpop.xlane.xlu1 %361 }
 0x169   : > { %v353_v51 = vpop.xlane.xlu0 %352  ;;  %v490_v54 = vadd.f32 %v486_v50, %v362_v52 }
 0x16a   : > { %v487_v53 = vadd.f32 %v483_v49, %v353_v51 }
 0x16b   : > { %495 = vst.msk [vmem:[%s1322_s5 + $0x18] sm:$0xff] %vm491_vm6, %v490_v54 }
 0x16c   : > { %492 = vst.msk [vmem:[%s1322_s5] sm:$0xff] %vm491_vm6, %v487_v53  ;;  %v466_v58 = vpop.xlane.xlu1 %465 }
 0x16d   : > { %v457_v57 = vpop.xlane.xlu0 %456  ;;  %v516_v60 = vadd.f32 %v512_v56, %v466_v58 }
 0x16e   : > { %v513_v59 = vadd.f32 %v509_v55, %v457_v57  ;;  %v498_v10 = vld [vmem:[%s1322_s5 + $0x10] sm:$0xff] }
 0x16f   : > { %520 = vst.msk [vmem:[%s1322_s5 + $0x38] sm:$0xff] %vm491_vm6, %v516_v60  ;;  %v523_v23 = vld [vmem:[%s1322_s5 + $0x30] sm:$0xff] }
 0x170   : > { %517 = vst.msk [vmem:[%s1322_s5 + $0x20] sm:$0xff] %vm491_vm6, %v513_v59  ;;  %v460_v63 = vpop.xlane.xlu1 %459 }
 0x171   : > { %v369_v62 = vpop.xlane.xlu0 %368  ;;  %v514_v0 = vadd.f32 %v510_v61, %v460_v63 }
 0x172   : > { %v499_v4 = vld [vmem:[%s1322_s5 + $0x18] sm:$0xff] }
 0x173   : > { %v496_v1 = vld [vmem:[%s1322_s5] sm:$0xff]  ;;  %518 = vst.msk [vmem:[%s1322_s5 + $0x28] sm:$0xff] %vm491_vm6, %v514_v0 }
 0x174   : > { %v500_v3 = vadd.f32 %v496_v1, %v369_v62  ;;  %v378_v5 = vpop.xlane.xlu1 %377 }
 0x175   : > { %v356_v6 = vpop.xlane.xlu0 %355  ;;  %v503_v7 = vadd.f32 %v499_v4, %v378_v5 }
 0x176   : > { %505 = vst.msk [vmem:[%s1322_s5] sm:$0xff] %vm504_vm7, %v500_v3  ;;  %v488_v8 = vadd.f32 %v484_v2, %v356_v6  ;;  %v524_v21 = vld [vmem:[%s1322_s5 + $0x38] sm:$0xff] }
 0x177   : > { %508 = vst.msk [vmem:[%s1322_s5 + $0x18] sm:$0xff] %vm504_vm7, %v503_v7  ;;  %v521_v15 = vld [vmem:[%s1322_s5 + $0x20] sm:$0xff] }
 0x178   : > { %493 = vst.msk [vmem:[%s1322_s5 + $0x8] sm:$0xff] %vm491_vm6, %v488_v8  ;;  %v372_v9 = vpop.xlane.xlu1 %371 }
 0x179   : > { %v375_v11 = vpop.xlane.xlu0 %374 }
 0x17a   : > { %v502_v12 = vadd.f32 %v498_v10, %v375_v11  ;;  %v522_v13 = vld [vmem:[%s1322_s5 + $0x28] sm:$0xff] }
 0x17c   : > { %507 = vst.msk [vmem:[%s1322_s5 + $0x10] sm:$0xff] %vm504_vm7, %v502_v12  ;;  %v476_v14 = vpop.xlane.xlu1 %475 }
 0x17d   : > { %v473_v16 = vpop.xlane.xlu0 %472  ;;  %v526_v17 = vadd.f32 %v522_v13, %v476_v14  ;;  %v538_v27 = vld [vmem:[%s1322_s5] sm:$0xff] (%p533_p6) }
 0x17e   : > { %v525_v18 = vadd.f32 %v521_v15, %v473_v16  ;;  %v1141_v30 = vmul.f32 (%p533_p6), 0.03125, %v538_v27  ;;  %v541_v33 = vld [vmem:[%s1322_s5 + $0x18] sm:$0xff] (%p533_p6)  ;;  %v610_v27 = vld [vmem:[%s1321_s4] sm:$0xff] (%p533_p6) }
 0x17f   : > { %v497_v19 = vld [vmem:[%s1322_s5 + $0x8] sm:$0xff]  ;;  %530 = vst.msk [vmem:[%s1322_s5 + $0x28] sm:$0xff] %vm504_vm7, %v526_v17  ;;  %v1150_v34 = vmul.f32 (%p533_p6), 0.03125, %v541_v33 }
 0x180   : > { %v501_v20 = vadd.f32 %v497_v19, %v372_v9  ;;  %529 = vst.msk [vmem:[%s1322_s5 + $0x20] sm:$0xff] %vm504_vm7, %v525_v18  ;;  %v482_v22 = vpop.xlane.xlu1 %481  ;;  %537 = sbr.rel (!%p533_p6) target bundleno = 782 (0x30e), region = 48  ;;  %v554_v37 = vmul.f32 (%p533_p6), %v1141_v30, %v1141_v30  ;;  %v611_v33 = vld [vmem:[%s1321_s4 + $0x8] sm:$0xff] (%p533_p6) }
 0x181   : > { %v479_v24 = vpop.xlane.xlu0 %478  ;;  %v528_v25 = vadd.f32 %v524_v21, %v482_v22  ;;  %v557_v40 = vmul.f32 (%p533_p6), %v1150_v34, %v1150_v34 }
 0x182   : > { %506 = vst.msk [vmem:[%s1322_s5 + $0x8] sm:$0xff] %vm504_vm7, %v501_v20  ;;  %v527_v26 = vadd.f32 %v523_v23, %v479_v24  ;;  %570 = vrot.lane.b32.xlu0 (%p533_p6), %v554_v37, %s904_s25 }
 0x183   : > { %532 = vst.msk [vmem:[%s1322_s5 + $0x38] sm:$0xff] %vm504_vm7, %v528_v25  ;;  %v540_v28 = vld [vmem:[%s1322_s5 + $0x10] sm:$0xff] (%p533_p6) }
 0x184   : > { %531 = vst.msk [vmem:[%s1322_s5 + $0x30] sm:$0xff] %vm504_vm7, %v527_v26  ;;  %v1143_v31 = vmul.f32 (%p533_p6), 0.03125, %v540_v28 }
 0x186   : > { %v543_v35 = vld [vmem:[%s1322_s5 + $0x28] sm:$0xff]  ;;  %v556_v38 = vmul.f32 %v1143_v31, %v1143_v31 }
 0x187   : > { %v542_v36 = vld [vmem:[%s1322_s5 + $0x20] sm:$0xff]  ;;  %v1168_v41 = vmul.f32 0.03125, %v543_v35  ;;  %v612_v35 = vld [vmem:[%s1321_s4 + $0x10] sm:$0xff] }
 0x188   : > { %574 = vrot.lane.b32.xlu1 %v556_v38, %s904_s25  ;;  %v1170_v42 = vmul.f32 0.03125, %v542_v36 }
 0x189   : > { %v539_v29 = vld [vmem:[%s1322_s5 + $0x8] sm:$0xff]  ;;  %v559_v45 = vmul.f32 %v1168_v41, %v1168_v41 }
 0x18a   : > { %v1145_v32 = vmul.f32 0.03125, %v539_v29  ;;  %v545_v43 = vld [vmem:[%s1322_s5 + $0x38] sm:$0xff]  ;;  %v558_v46 = vmul.f32 %v1170_v42, %v1170_v42 }
 0x18b   : > { %v544_v44 = vld [vmem:[%s1322_s5 + $0x30] sm:$0xff]  ;;  %v1184_v47 = vmul.f32 0.03125, %v545_v43  ;;  %v613_v43 = vld [vmem:[%s1321_s4 + $0x18] sm:$0xff] }
 0x18c   : > { %v555_v39 = vmul.f32 %v1145_v32, %v1145_v32  ;;  %576 = vrot.lane.b32.xlu1 %v557_v40, %s904_s25  ;;  %v1186_v48 = vmul.f32 0.03125, %v544_v44 }
 0x18d   : > { %v561_v49 = vmul.f32 %v1184_v47, %v1184_v47 }
 0x18e   : > { %572 = vrot.lane.b32.xlu0 %v555_v39, %s904_s25  ;;  %v560_v50 = vmul.f32 %v1186_v48, %v1186_v48 }
 0x190   : > { %580 = vrot.lane.b32.xlu1 %v559_v45, %s904_s25  ;;  %v614_v45 = vld [vmem:[%s1321_s4 + $0x20] sm:$0xff] }
 0x192   : > { %578 = vrot.lane.b32.xlu0 %v558_v46, %s904_s25 }
 0x194   : > { %584 = vrot.lane.b32.xlu1 %v561_v49, %s904_s25 }
 0x196   : > { %582 = vrot.lane.b32.xlu0 %v560_v50, %s904_s25 }
 0x1f4   : > { %v571_v51 = vpop.permute.xlu0 %570 }
 0x1f5   : > { %v594_v53 = vsub.f32 %v1141_v30, %v571_v51 }
 0x1f7   : > { %v602_v55 = vmax.f32 %v594_v53, 0.0 }
 0x1f9   : > { %v618_v59 = vadd.f32 1e-05, %v602_v55 }
 0x1fa   : > { %v575_v52 = vpop.permute.xlu1 %574 }
 0x1fb   : > { %v596_v54 = vsub.f32 %v1143_v31, %v575_v52  ;;  %863 = vrsqrt.f32 %v618_v59  ;;  %v616_v52 = vld [vmem:[%s1321_s4 + $0x30] sm:$0xff] }
 0x1fd   : > { %v604_v56 = vmax.f32 %v596_v54, 0.0 }
 0x1fe   : > { %v577_v58 = vpop.permute.xlu1 %576 }
 0x1ff   : > { %v620_v60 = vadd.f32 1e-05, %v604_v56  ;;  %v597_v62 = vsub.f32 %v1150_v34, %v577_v58  ;;  %v617_v56 = vld [vmem:[%s1321_s4 + $0x38] sm:$0xff] }
 0x200   : > { %v573_v57 = vpop.permute.xlu0 %572 }
 0x201   : > { %v595_v61 = vsub.f32 %v1145_v32, %v573_v57  ;;  %v605_v0 = vmax.f32 %v597_v62, 0.0  ;;  %865 = vrsqrt.f32 %v620_v60 }
 0x202   : > { %v581_v1 = vpop.permute.xlu1 %580 }
 0x203   : > { %v603_v63 = vmax.f32 %v595_v61, 0.0  ;;  %v621_v4 = vadd.f32 1e-05, %v605_v0  ;;  %v599_v5 = vsub.f32 %v1168_v41, %v581_v1 }
 0x204   : > { %v579_v2 = vpop.permute.xlu0 %578 }
 0x205   : > { %v619_v3 = vadd.f32 1e-05, %v603_v63  ;;  %v598_v6 = vsub.f32 %v1170_v42, %v579_v2  ;;  %v607_v7 = vmax.f32 %v599_v5, 0.0 }
 0x206   : > { %v585_v9 = vpop.permute.xlu1 %584 }
 0x207   : > { %867 = vrsqrt.f32 %v619_v3  ;;  %v606_v8 = vmax.f32 %v598_v6, 0.0  ;;  %v623_v11 = vadd.f32 1e-05, %v607_v7  ;;  %v601_v13 = vsub.f32 %v1184_v47, %v585_v9 }
 0x208   : > { %869 = vrsqrt.f32 %v621_v4  ;;  %v583_v10 = vpop.permute.xlu0 %582  ;;  %v864_v19 = vpop.eup %863 }
 0x209   : > { %v622_v12 = vadd.f32 1e-05, %v606_v8  ;;  %v600_v14 = vsub.f32 %v1186_v48, %v583_v10  ;;  %v609_v15 = vmax.f32 %v601_v13, 0.0  ;;  %642 = vrot.lane.b32.xlu0 %v864_v19, %s905_s7 }
 0x20b   : > { %v608_v16 = vmax.f32 %v600_v14, 0.0  ;;  %871 = vrsqrt.f32 %v622_v12  ;;  %v625_v17 = vadd.f32 1e-05, %v609_v15 }
 0x20c   : > { %873 = vrsqrt.f32 %v623_v11 }
 0x20d   : > { %v624_v18 = vadd.f32 1e-05, %v608_v16 }
 0x20e   : > { %v866_v20 = vpop.eup %865 }
 0x20f   : > { %875 = vrsqrt.f32 %v624_v18  ;;  %646 = vrot.lane.b32.xlu0 %v866_v20, %s905_s7 }
 0x210   : > { %877 = vrsqrt.f32 %v625_v17 }
 0x214   : > { %v868_v21 = vpop.eup %867 }
 0x215   : > { %v870_v22 = vpop.eup %869  ;;  %644 = vrot.lane.b32.xlu1 %v868_v21, %s905_s7 }
 0x218   : > { %v872_v23 = vpop.eup %871 }
 0x219   : > { %648 = vrot.lane.b32.xlu1 %v870_v22, %s905_s7  ;;  %v874_v24 = vpop.eup %873  ;;  %650 = vrot.lane.b32.xlu0 %v872_v23, %s905_s7 }
 0x21c   : > { %v876_v25 = vpop.eup %875 }
 0x21d   : > { %652 = vrot.lane.b32.xlu1 %v874_v24, %s905_s7  ;;  %v878_v26 = vpop.eup %877  ;;  %654 = vrot.lane.b32.xlu0 %v876_v25, %s905_s7 }
 0x221   : > { %656 = vrot.lane.b32.xlu1 %v878_v26, %s905_s7 }
 0x27b   : > { %v643_v28 = vpop.permute.xlu0 %642 }
 0x27c   : > { %v666_v29 = vmul.f32 %v643_v28, %v610_v27 }
 0x27e   : > { %v674_v36 = vmul.f32 %v666_v29, %v1141_v30  ;;  %722 = vst.msk [vmem:[%s1322_s5] sm:$0xff] %vm491_vm6, %v666_v29 }
 0x280   : > { %690 = vrot.lane.b32.xlu0 %v674_v36, %s904_s25 }
 0x281   : > { %v647_v38 = vpop.permute.xlu0 %646 }
 0x282   : > { %v668_v40 = vmul.f32 %v647_v38, %v612_v35 }
 0x284   : > { %v676_v30 = vmul.f32 %v668_v40, %v1143_v31  ;;  %724 = vst.msk [vmem:[%s1322_s5 + $0x10] sm:$0xff] %vm491_vm6, %v668_v40  ;;  %v615_v31 = vld [vmem:[%s1321_s4 + $0x28] sm:$0xff] }
 0x286   : > { %694 = vrot.lane.b32.xlu0 %v676_v30, %s904_s25 }
 0x287   : > { %v645_v37 = vpop.permute.xlu1 %644 }
 0x288   : > { %v667_v39 = vmul.f32 %v645_v37, %v611_v33 }
 0x28a   : > { %v675_v44 = vmul.f32 %v667_v39, %v1145_v32  ;;  %723 = vst.msk [vmem:[%s1322_s5 + $0x8] sm:$0xff] %vm491_vm6, %v667_v39 }
 0x28b   : > { %v649_v46 = vpop.permute.xlu1 %648  ;;  %v651_v32 = vpop.permute.xlu0 %650 }
 0x28c   : > { %v669_v49 = vmul.f32 %v649_v46, %v613_v43  ;;  %692 = vrot.lane.b32.xlu1 %v675_v44, %s904_s25  ;;  %v670_v50 = vmul.f32 %v651_v32, %v614_v45 }
 0x28e   : > { %v677_v51 = vmul.f32 %v669_v49, %v1150_v34  ;;  %725 = vst.msk [vmem:[%s1322_s5 + $0x18] sm:$0xff] %vm491_vm6, %v669_v49  ;;  %v678_v54 = vmul.f32 %v670_v50, %v1170_v42  ;;  %726 = vst.msk [vmem:[%s1322_s5 + $0x20] sm:$0xff] %vm491_vm6, %v670_v50 }
 0x28f   : > { %v653_v53 = vpop.permute.xlu1 %652  ;;  %v655_v34 = vpop.permute.xlu0 %654 }
 0x290   : > { %v671_v55 = vmul.f32 %v653_v53, %v615_v31  ;;  %696 = vrot.lane.b32.xlu1 %v677_v51, %s904_s25  ;;  %v672_v57 = vmul.f32 %v655_v34, %v616_v52  ;;  %698 = vrot.lane.b32.xlu0 %v678_v54, %s904_s25 }
 0x292   : > { %v679_v58 = vmul.f32 %v671_v55, %v1168_v41  ;;  %727 = vst.msk [vmem:[%s1322_s5 + $0x28] sm:$0xff] %vm491_vm6, %v671_v55  ;;  %v680_v59 = vmul.f32 %v672_v57, %v1186_v48  ;;  %728 = vst.msk [vmem:[%s1322_s5 + $0x30] sm:$0xff] %vm491_vm6, %v672_v57 }
 0x293   : > { %v657_v42 = vpop.permute.xlu1 %656 }
 0x294   : > { %v673_v60 = vmul.f32 %v657_v42, %v617_v56  ;;  %700 = vrot.lane.b32.xlu1 %v679_v58, %s904_s25  ;;  %702 = vrot.lane.b32.xlu0 %v680_v59, %s904_s25 }
 0x296   : > { %v681_v41 = vmul.f32 %v673_v60, %v1184_v47  ;;  %729 = vst.msk [vmem:[%s1322_s5 + $0x38] sm:$0xff] %vm491_vm6, %v673_v60 }
 0x298   : > { %704 = vrot.lane.b32.xlu1 %v681_v41, %s904_s25 }
 0x2f2   : > { %v691_v48 = vpop.permute.xlu0 %690 }
 0x2f3   : > { %v714_v61 = vsub.f32 %v610_v27, %v691_v48 }
 0x2f5   : > { %730 = vst.msk [vmem:[%s1322_s5] sm:$0xff] %vm504_vm7, %v714_v61 }
 0x2f8   : > { %v695_v63 = vpop.permute.xlu0 %694 }
 0x2f9   : > { %v716_v1 = vsub.f32 %v612_v35, %v695_v63 }
 0x2fb   : > { %732 = vst.msk [vmem:[%s1322_s5 + $0x10] sm:$0xff] %vm504_vm7, %v716_v1 }
 0x2fe   : > { %v693_v62 = vpop.permute.xlu1 %692 }
 0x2ff   : > { %v715_v0 = vsub.f32 %v611_v33, %v693_v62 }
 0x301   : > { %731 = vst.msk [vmem:[%s1322_s5 + $0x8] sm:$0xff] %vm504_vm7, %v715_v0 }
 0x302   : > { %v697_v47 = vpop.permute.xlu1 %696  ;;  %v699_v3 = vpop.permute.xlu0 %698 }
 0x303   : > { %v717_v2 = vsub.f32 %v613_v43, %v697_v47  ;;  %v718_v4 = vsub.f32 %v614_v45, %v699_v3 }
 0x305   : > { %733 = vst.msk [vmem:[%s1322_s5 + $0x18] sm:$0xff] %vm504_vm7, %v717_v2  ;;  %734 = vst.msk [vmem:[%s1322_s5 + $0x20] sm:$0xff] %vm504_vm7, %v718_v4 }
 0x306   : > { %v701_v5 = vpop.permute.xlu1 %700  ;;  %v703_v7 = vpop.permute.xlu0 %702 }
 0x307   : > { %v719_v6 = vsub.f32 %v615_v31, %v701_v5  ;;  %v720_v8 = vsub.f32 %v616_v52, %v703_v7 }
 0x309   : > { %735 = vst.msk [vmem:[%s1322_s5 + $0x28] sm:$0xff] %vm504_vm7, %v719_v6  ;;  %736 = vst.msk [vmem:[%s1322_s5 + $0x30] sm:$0xff] %vm504_vm7, %v720_v8 }
 0x30a   : > { %v705_v9 = vpop.permute.xlu1 %704 }
 0x30b   : > { %v721_v10 = vsub.f32 %v617_v56, %v705_v9 }
 0x30d   : > { %737 = vst.msk [vmem:[%s1322_s5 + $0x38] sm:$0xff] %vm504_vm7, %v721_v10 }
 0x30e PF: > { %s15_s20 = sadd.s32 1, %s901_s20   ;;  %s1323_s18 = smov %s897_s19 }
 0x30f   : > { %p12_p7 = scmp.ge.s32.totalorder %s15_s20, 4   ;;  %s1324_s19 = smov %s1326_s21 }
 0x311   :  { %14 = sbr.rel (!%p12_p7) target bundleno = 2 (0x2), region = 77 }

</bundles_post_ra>
